<compile_context>
chip_gen: v7x
topology: tpu7x:2x2x1
jax: 0.10.0
libtpu: 0.0.40
codegen_flags: <defaults>
</compile_context>

<pallas_src>
import jax
import jax.numpy as jnp
from jax.experimental import pallas as pl
from jax.experimental.pallas import tpu as pltpu


def icm_kernel(x_ref, act_ref, we1_ref, wf1b_ref, wslab_ref, bslab_ref,
               cur_ref, loss_ref):
    f32 = jnp.float32

    x = x_ref[...]                                   # (2B, input_dim): [state; next_state]
    B = x.shape[0] // 2
    F = we1_ref.shape[1]                             # feature_dim
    A = wf1b_ref.shape[0]                            # action_dim

    # ---- static slices of the pre-packed bias slab (1, 5F+A) ----
    be1 = bslab_ref[:, 0 * F:1 * F]
    be2 = bslab_ref[:, 1 * F:2 * F]
    bi1 = bslab_ref[:, 2 * F:3 * F]
    bf1 = bslab_ref[:, 3 * F:4 * F]
    bf2 = bslab_ref[:, 4 * F:5 * F]
    bi2 = bslab_ref[:, 5 * F:5 * F + A]

    # ---- fused encoder: one pass over [state; next_state] ----
    h = jnp.maximum(jnp.dot(x, we1_ref[...], preferred_element_type=f32) + be1, 0.0)
    phi = jnp.dot(h, wslab_ref[:, 0:F], preferred_element_type=f32) + be2   # (2B, F)
    phi_s = phi[:B]                                   # sublane-aligned slices (B = multiple of 8)
    phi_sn = phi[B:]

    # ---- one-hot(action) via 2-D iota (TPU needs >=2D iota) ----
    act = act_ref[...]                                # (B, 1) int32
    onehot = (jax.lax.broadcasted_iota(jnp.int32, (B, A), 1) == act).astype(f32)

    # ---- fused first layers: phi_s drives [wi1a | wf1a] in one 256-wide matmul ----
    part_s = jnp.dot(phi_s, wslab_ref[:, F:3 * F], preferred_element_type=f32)    # (B, 2F)
    part_n = jnp.dot(phi_sn, wslab_ref[:, 3 * F:4 * F], preferred_element_type=f32)  # (B, F)
    part_a = jnp.dot(onehot, wf1b_ref[...], preferred_element_type=f32)           # (B, F)
    hi = jnp.maximum(part_s[:, :F] + part_n + bi1, 0.0)   # inverse-model hidden
    hf = jnp.maximum(part_s[:, F:] + part_a + bf1, 0.0)   # forward-model hidden

    # ---- fused second layers: [hi; hf] @ [wf2 | wi2] in one matmul ----
    hh = jnp.concatenate([hi, hf], axis=0)                                         # (2B, F)
    out2 = jnp.dot(hh, wslab_ref[:, 4 * F:5 * F + A], preferred_element_type=f32)  # (2B, F+A)
    logits = out2[:B, F:F + A] + bi2        # hi rows x wi2 columns
    pred_phi_next = out2[B:, :F] + bf2      # hf rows x wf2 columns

    # ---- inverse loss: cross entropy (mean over batch) ----
    m = jnp.max(logits, axis=-1, keepdims=True)
    lse = m + jnp.log(jnp.sum(jnp.exp(logits - m), axis=-1, keepdims=True))
    correct = jnp.sum(logits * onehot, axis=-1, keepdims=True)
    inv_loss = jnp.mean(lse - correct)

    # ---- forward loss / curiosity ----
    diff2 = (pred_phi_next - phi_sn) ** 2
    fwd_loss = jnp.mean(diff2)
    cur = jnp.mean(diff2, axis=-1, keepdims=True)     # (B, 1)
    cmin = jnp.min(cur)
    cmax = jnp.max(cur)
    # note: exact divide kept (one op on B values); approx reciprocal risks rtol=1e-4.
    cur_norm = (cur - cmin) / (cmax - cmin + 1e-8)

    # ---- lane-dense outputs ----
    cur_ref[...] = jnp.broadcast_to(cur_norm, cur_ref.shape)          # (B, 128) unmasked store
    lane = jax.lax.broadcasted_iota(jnp.int32, loss_ref.shape, 1)
    loss_ref[...] = jnp.where(lane == 0, fwd_loss,
                              jnp.where(lane == 1, inv_loss, 0.0))    # (1, 128) single row


def pack_params(params):
    """Pre-concatenate the 14 weight/bias arrays into a few VMEM slabs."""
    wslab = jnp.concatenate(
        [params["we2"], params["wi1a"], params["wf1a"],
         params["wi1b"], params["wf2"], params["wi2"]], axis=1)       # (F, 5F+A)
    bslab = jnp.concatenate(
        [params["be1"], params["be2"], params["bi1"],
         params["bf1"], params["bf2"], params["bi2"]], axis=1)        # (1, 5F+A)
    return {"we1": params["we1"], "wf1b": params["wf1b"],
            "wslab": wslab, "bslab": bslab}


def icm_forward(state, next_state, action, packed):
    B = state.shape[0]

    x_stack = jnp.concatenate([state, next_state], axis=0)            # (2B, input_dim)
    action2d = action.astype(jnp.int32).reshape(B, 1)

    vmem = pl.BlockSpec(memory_space=pltpu.MemorySpace.VMEM)
    operands = (x_stack, action2d, packed["we1"], packed["wf1b"],
                packed["wslab"], packed["bslab"])

    cur_b, loss_row = pl.pallas_call(
        icm_kernel,
        out_shape=(
            jax.ShapeDtypeStruct((B, 128), jnp.float32),   # curiosity (lane-broadcast)
            jax.ShapeDtypeStruct((1, 128), jnp.float32),   # [fwd_loss, inv_loss, 0...]
        ),
        in_specs=[vmem] * len(operands),
        out_specs=(vmem, vmem),
    )(*operands)

    return cur_b[:, 0], loss_row[0, 0], loss_row[0, 1]


def init_params(key, input_dim, action_dim, feature_dim):
    """Deterministic init mimicking nn.Linear default (uniform(-1/sqrt(in), 1/sqrt(in))).
    Weights are stored as [in, out] (transposed vs. PyTorch)."""
    def linear(key, fan_in, fan_out):
        kw, kb = jax.random.split(key)
        bound = 1.0 / jnp.sqrt(fan_in)
        w = jax.random.uniform(kw, (fan_in, fan_out), jnp.float32, -bound, bound)
        b = jax.random.uniform(kb, (1, fan_out), jnp.float32, -bound, bound)
        return w, b

    keys = jax.random.split(key, 6)
    we1, be1 = linear(keys[0], input_dim, feature_dim)
    we2, be2 = linear(keys[1], feature_dim, feature_dim)
    wi1, bi1 = linear(keys[2], 2 * feature_dim, feature_dim)
    wi2, bi2 = linear(keys[3], feature_dim, action_dim)
    wf1, bf1 = linear(keys[4], feature_dim + action_dim, feature_dim)
    wf2, bf2 = linear(keys[5], feature_dim, feature_dim)

    return {
        "we1": we1, "be1": be1, "we2": we2, "be2": be2,
        # split first layers so no concat is needed for the LHS in the kernel
        "wi1a": wi1[:feature_dim], "wi1b": wi1[feature_dim:], "bi1": bi1,
        "wi2": wi2, "bi2": bi2,
        "wf1a": wf1[:feature_dim], "wf1b": wf1[feature_dim:], "bf1": bf1,
        "wf2": wf2, "bf2": bf2,
    }


def icm_reference(state, next_state, action, params, action_dim):
    """Pure-JAX reference mirroring the PyTorch forward."""
    def enc(x):
        h = jnp.maximum(x @ params["we1"] + params["be1"], 0.0)
        return h @ params["we2"] + params["be2"]

    phi_s, phi_sn = enc(state), enc(next_state)
    onehot = jax.nn.one_hot(action, action_dim, dtype=jnp.float32)

    hi = jnp.maximum(phi_s @ params["wi1a"] + phi_sn @ params["wi1b"] + params["bi1"], 0.0)
    logits = hi @ params["wi2"] + params["bi2"]
    logp = jax.nn.log_softmax(logits, axis=-1)
    inv_loss = -jnp.mean(jnp.sum(logp * onehot, axis=-1))

    hf = jnp.maximum(phi_s @ params["wf1a"] + onehot @ params["wf1b"] + params["bf1"], 0.0)
    pred = hf @ params["wf2"] + params["bf2"]
    diff2 = (pred - phi_sn) ** 2
    fwd_loss = jnp.mean(diff2)
    cur = jnp.mean(diff2, axis=1)
    cur = (cur - cur.min()) / (cur.max() - cur.min() + 1e-8)
    return cur, fwd_loss, inv_loss


if __name__ == "__main__":
    BATCH, INPUT_DIM, ACTION_DIM, FEATURE_DIM = 8, 32, 8, 128

    key = jax.random.PRNGKey(0)
    kp, ks, ksn, ka = jax.random.split(key, 4)

    params = init_params(kp, INPUT_DIM, ACTION_DIM, FEATURE_DIM)
    packed = pack_params(params)

    state = jax.random.normal(ks, (BATCH, INPUT_DIM), jnp.float32)
    next_state = jax.random.normal(ksn, (BATCH, INPUT_DIM), jnp.float32)
    action = jax.random.randint(ka, (BATCH,), 0, ACTION_DIM, jnp.int32)

    cur, fwd_loss, inv_loss = jax.block_until_ready(
        icm_forward(state, next_state, action, packed)
    )

    cur_ref, fwd_ref, inv_ref = icm_reference(state, next_state, action, params, ACTION_DIM)
    assert jnp.allclose(cur, cur_ref, rtol=1e-4, atol=1e-5)
    assert jnp.allclose(fwd_loss, fwd_ref, rtol=1e-4, atol=1e-6)
    assert jnp.allclose(inv_loss, inv_ref, rtol=1e-4, atol=1e-6)

    print("KERNEL_OK")
</pallas_src>

<mosaic_0001>
module attributes {stable_mosaic.version = 11 : i64} {
  func.func @icm_kernel(%arg0: memref<16x32xf32, #tpu.memory_space<vmem>>, %arg1: memref<8x1xi32, #tpu.memory_space<vmem>>, %arg2: memref<32x128xf32, #tpu.memory_space<vmem>>, %arg3: memref<8x128xf32, #tpu.memory_space<vmem>>, %arg4: memref<128x648xf32, #tpu.memory_space<vmem>>, %arg5: memref<1x648xf32, #tpu.memory_space<vmem>>, %arg6: memref<8x128xf32, #tpu.memory_space<vmem>>, %arg7: memref<1x128xf32, #tpu.memory_space<vmem>>) attributes {dimension_semantics = [], scalar_prefetch = 0 : i64, scratch_operands = 0 : i64, tpu.core_type = #tpu.core_type<tc>} {
    %c0 = arith.constant 0 : index
    %c0_0 = arith.constant 0 : index
    %0 = vector.load %arg0[%c0, %c0_0] : memref<16x32xf32, #tpu.memory_space<vmem>>, vector<16x32xf32>
    %c0_1 = arith.constant 0 : index
    %c0_2 = arith.constant 0 : index
    %1 = vector.load %arg5[%c0_1, %c0_2] : memref<1x648xf32, #tpu.memory_space<vmem>>, vector<1x128xf32>
    %c0_3 = arith.constant 0 : index
    %c128 = arith.constant 128 : index
    %2 = vector.load %arg5[%c0_3, %c128] : memref<1x648xf32, #tpu.memory_space<vmem>>, vector<1x128xf32>
    %c0_4 = arith.constant 0 : index
    %c256 = arith.constant 256 : index
    %3 = vector.load %arg5[%c0_4, %c256] : memref<1x648xf32, #tpu.memory_space<vmem>>, vector<1x128xf32>
    %c0_5 = arith.constant 0 : index
    %c384 = arith.constant 384 : index
    %4 = vector.load %arg5[%c0_5, %c384] : memref<1x648xf32, #tpu.memory_space<vmem>>, vector<1x128xf32>
    %c0_6 = arith.constant 0 : index
    %c512 = arith.constant 512 : index
    %5 = vector.load %arg5[%c0_6, %c512] : memref<1x648xf32, #tpu.memory_space<vmem>>, vector<1x128xf32>
    %c0_7 = arith.constant 0 : index
    %c640 = arith.constant 640 : index
    %6 = vector.load %arg5[%c0_7, %c640] : memref<1x648xf32, #tpu.memory_space<vmem>>, vector<1x8xf32>
    %c0_8 = arith.constant 0 : index
    %c0_9 = arith.constant 0 : index
    %7 = vector.load %arg2[%c0_8, %c0_9] : memref<32x128xf32, #tpu.memory_space<vmem>>, vector<32x128xf32>
    %cst = arith.constant dense<0.000000e+00> : vector<16x128xf32>
    %8 = tpu.matmul %0, %7, %cst {dimension_numbers = #tpu.dot_dimension_numbers<[1], [0], [0], [1], [0, 0, 1, 1], [], []>} : vector<16x32xf32>, vector<32x128xf32>, vector<16x128xf32> -> vector<16x128xf32>
    %9 = vector.broadcast %1 : vector<1x128xf32> to vector<16x128xf32>
    %10 = arith.addf %8, %9 : vector<16x128xf32>
    %cst_10 = arith.constant 0.000000e+00 : f32
    %11 = vector.broadcast %cst_10 : f32 to vector<16x128xf32>
    %12 = arith.maximumf %10, %11 : vector<16x128xf32>
    %c0_11 = arith.constant 0 : index
    %c0_12 = arith.constant 0 : index
    %13 = vector.load %arg4[%c0_11, %c0_12] : memref<128x648xf32, #tpu.memory_space<vmem>>, vector<128x128xf32>
    %cst_13 = arith.constant dense<0.000000e+00> : vector<16x128xf32>
    %14 = tpu.matmul %12, %13, %cst_13 {dimension_numbers = #tpu.dot_dimension_numbers<[1], [0], [0], [1], [0, 0, 1, 1], [], []>} : vector<16x128xf32>, vector<128x128xf32>, vector<16x128xf32> -> vector<16x128xf32>
    %15 = vector.broadcast %2 : vector<1x128xf32> to vector<16x128xf32>
    %16 = arith.addf %14, %15 : vector<16x128xf32>
    %17 = vector.extract_strided_slice %16 {offsets = [0, 0], sizes = [8, 128], strides = [1, 1]} : vector<16x128xf32> to vector<8x128xf32>
    %18 = vector.extract_strided_slice %16 {offsets = [8, 0], sizes = [8, 128], strides = [1, 1]} : vector<16x128xf32> to vector<8x128xf32>
    %c0_14 = arith.constant 0 : index
    %c0_15 = arith.constant 0 : index
    %19 = vector.load %arg1[%c0_14, %c0_15] : memref<8x1xi32, #tpu.memory_space<vmem>>, vector<8x1xi32>
    %20 = tpu.iota {dimensions = array<i32: 1>} : vector<8x8xi32>
    %21 = vector.broadcast %19 : vector<8x1xi32> to vector<8x8xi32>
    %22 = arith.cmpi eq, %20, %21 : vector<8x8xi32>
    %23 = arith.extui %22 : vector<8x8xi1> to vector<8x8xi32>
    %24 = arith.sitofp %23 : vector<8x8xi32> to vector<8x8xf32>
    %c0_16 = arith.constant 0 : index
    %c128_17 = arith.constant 128 : index
    %25 = vector.load %arg4[%c0_16, %c128_17] : memref<128x648xf32, #tpu.memory_space<vmem>>, vector<128x256xf32>
    %cst_18 = arith.constant dense<0.000000e+00> : vector<8x256xf32>
    %26 = tpu.matmul %17, %25, %cst_18 {dimension_numbers = #tpu.dot_dimension_numbers<[1], [0], [0], [1], [0, 0, 1, 1], [], []>} : vector<8x128xf32>, vector<128x256xf32>, vector<8x256xf32> -> vector<8x256xf32>
    %c0_19 = arith.constant 0 : index
    %c384_20 = arith.constant 384 : index
    %27 = vector.load %arg4[%c0_19, %c384_20] : memref<128x648xf32, #tpu.memory_space<vmem>>, vector<128x128xf32>
    %cst_21 = arith.constant dense<0.000000e+00> : vector<8x128xf32>
    %28 = tpu.matmul %18, %27, %cst_21 {dimension_numbers = #tpu.dot_dimension_numbers<[1], [0], [0], [1], [0, 0, 1, 1], [], []>} : vector<8x128xf32>, vector<128x128xf32>, vector<8x128xf32> -> vector<8x128xf32>
    %c0_22 = arith.constant 0 : index
    %c0_23 = arith.constant 0 : index
    %29 = vector.load %arg3[%c0_22, %c0_23] : memref<8x128xf32, #tpu.memory_space<vmem>>, vector<8x128xf32>
    %cst_24 = arith.constant dense<0.000000e+00> : vector<8x128xf32>
    %30 = tpu.matmul %24, %29, %cst_24 {dimension_numbers = #tpu.dot_dimension_numbers<[1], [0], [0], [1], [0, 0, 1, 1], [], []>} : vector<8x8xf32>, vector<8x128xf32>, vector<8x128xf32> -> vector<8x128xf32>
    %31 = vector.extract_strided_slice %26 {offsets = [0, 0], sizes = [8, 128], strides = [1, 1]} : vector<8x256xf32> to vector<8x128xf32>
    %32 = arith.addf %31, %28 : vector<8x128xf32>
    %33 = vector.broadcast %3 : vector<1x128xf32> to vector<8x128xf32>
    %34 = arith.addf %32, %33 : vector<8x128xf32>
    %cst_25 = arith.constant 0.000000e+00 : f32
    %35 = vector.broadcast %cst_25 : f32 to vector<8x128xf32>
    %36 = arith.maximumf %34, %35 : vector<8x128xf32>
    %37 = vector.extract_strided_slice %26 {offsets = [0, 128], sizes = [8, 128], strides = [1, 1]} : vector<8x256xf32> to vector<8x128xf32>
    %38 = arith.addf %37, %30 : vector<8x128xf32>
    %39 = vector.broadcast %4 : vector<1x128xf32> to vector<8x128xf32>
    %40 = arith.addf %38, %39 : vector<8x128xf32>
    %cst_26 = arith.constant 0.000000e+00 : f32
    %41 = vector.broadcast %cst_26 : f32 to vector<8x128xf32>
    %42 = arith.maximumf %40, %41 : vector<8x128xf32>
    %43 = tpu.concatenate %36, %42 in 0 : vector<8x128xf32>, vector<8x128xf32> -> vector<16x128xf32>
    %c0_27 = arith.constant 0 : index
    %c512_28 = arith.constant 512 : index
    %44 = vector.load %arg4[%c0_27, %c512_28] : memref<128x648xf32, #tpu.memory_space<vmem>>, vector<128x136xf32>
    %cst_29 = arith.constant dense<0.000000e+00> : vector<16x136xf32>
    %45 = tpu.matmul %43, %44, %cst_29 {dimension_numbers = #tpu.dot_dimension_numbers<[1], [0], [0], [1], [0, 0, 1, 1], [], []>} : vector<16x128xf32>, vector<128x136xf32>, vector<16x136xf32> -> vector<16x136xf32>
    %46 = vector.extract_strided_slice %45 {offsets = [0, 128], sizes = [8, 8], strides = [1, 1]} : vector<16x136xf32> to vector<8x8xf32>
    %47 = vector.broadcast %6 : vector<1x8xf32> to vector<8x8xf32>
    %48 = arith.addf %46, %47 : vector<8x8xf32>
    %49 = vector.extract_strided_slice %45 {offsets = [8, 0], sizes = [8, 128], strides = [1, 1]} : vector<16x136xf32> to vector<8x128xf32>
    %50 = vector.broadcast %5 : vector<1x128xf32> to vector<8x128xf32>
    %51 = arith.addf %49, %50 : vector<8x128xf32>
    %cst_30 = arith.constant dense<0xFF800000> : vector<8xf32>
    %52 = vector.multi_reduction <maximumf>, %48, %cst_30 [1] : vector<8x8xf32> to vector<8xf32>
    %53 = vector.shape_cast %52 : vector<8xf32> to vector<8x1xf32>
    %54 = vector.broadcast %53 : vector<8x1xf32> to vector<8x8xf32>
    %55 = arith.subf %48, %54 : vector<8x8xf32>
    %56 = math.exp %55 : vector<8x8xf32>
    %cst_31 = arith.constant dense<0.000000e+00> : vector<8xf32>
    %57 = vector.multi_reduction <add>, %56, %cst_31 [1] : vector<8x8xf32> to vector<8xf32>
    %58 = vector.shape_cast %57 : vector<8xf32> to vector<8x1xf32>
    %59 = math.log %58 : vector<8x1xf32>
    %60 = arith.addf %53, %59 : vector<8x1xf32>
    %61 = arith.mulf %48, %24 : vector<8x8xf32>
    %cst_32 = arith.constant dense<0.000000e+00> : vector<8xf32>
    %62 = vector.multi_reduction <add>, %61, %cst_32 [1] : vector<8x8xf32> to vector<8xf32>
    %63 = vector.shape_cast %62 : vector<8xf32> to vector<8x1xf32>
    %64 = arith.subf %60, %63 : vector<8x1xf32>
    %65 = vector.shape_cast %64 : vector<8x1xf32> to vector<1x8x1xf32>
    %cst_33 = arith.constant dense<0.000000e+00> : vector<1xf32>
    %66 = vector.multi_reduction <add>, %65, %cst_33 [1, 2] : vector<1x8x1xf32> to vector<1xf32>
    %67 = vector.shape_cast %66 : vector<1xf32> to vector<1x1x1xf32>
    %68 = vector.extract %67[0, 0, 0] : f32 from vector<1x1x1xf32>
    %cst_34 = arith.constant 8.000000e+00 : f32
    %69 = arith.divf %68, %cst_34 : f32
    %70 = arith.subf %51, %18 : vector<8x128xf32>
    %71 = arith.mulf %70, %70 : vector<8x128xf32>
    %72 = vector.shape_cast %71 : vector<8x128xf32> to vector<1x8x128xf32>
    %cst_35 = arith.constant dense<0.000000e+00> : vector<1xf32>
    %73 = vector.multi_reduction <add>, %72, %cst_35 [1, 2] : vector<1x8x128xf32> to vector<1xf32>
    %74 = vector.shape_cast %73 : vector<1xf32> to vector<1x1x1xf32>
    %75 = vector.extract %74[0, 0, 0] : f32 from vector<1x1x1xf32>
    %cst_36 = arith.constant 1.024000e+03 : f32
    %76 = arith.divf %75, %cst_36 : f32
    %cst_37 = arith.constant dense<0.000000e+00> : vector<8xf32>
    %77 = vector.multi_reduction <add>, %71, %cst_37 [1] : vector<8x128xf32> to vector<8xf32>
    %78 = vector.shape_cast %77 : vector<8xf32> to vector<8x1xf32>
    %cst_38 = arith.constant 1.280000e+02 : f32
    %79 = vector.broadcast %cst_38 : f32 to vector<8x1xf32>
    %80 = arith.divf %78, %79 : vector<8x1xf32>
    %81 = vector.shape_cast %80 : vector<8x1xf32> to vector<1x8x1xf32>
    %cst_39 = arith.constant dense<0x7F800000> : vector<1xf32>
    %82 = vector.multi_reduction <minimumf>, %81, %cst_39 [1, 2] : vector<1x8x1xf32> to vector<1xf32>
    %83 = vector.shape_cast %82 : vector<1xf32> to vector<1x1x1xf32>
    %84 = vector.extract %83[0, 0, 0] : f32 from vector<1x1x1xf32>
    %85 = vector.shape_cast %80 : vector<8x1xf32> to vector<1x8x1xf32>
    %cst_40 = arith.constant dense<0xFF800000> : vector<1xf32>
    %86 = vector.multi_reduction <maximumf>, %85, %cst_40 [1, 2] : vector<1x8x1xf32> to vector<1xf32>
    %87 = vector.shape_cast %86 : vector<1xf32> to vector<1x1x1xf32>
    %88 = vector.extract %87[0, 0, 0] : f32 from vector<1x1x1xf32>
    %89 = vector.broadcast %84 : f32 to vector<8x1xf32>
    %90 = arith.subf %80, %89 : vector<8x1xf32>
    %91 = arith.subf %88, %84 : f32
    %cst_41 = arith.constant 9.99999993E-9 : f32
    %92 = arith.addf %91, %cst_41 : f32
    %93 = vector.broadcast %92 : f32 to vector<8x1xf32>
    %94 = arith.divf %90, %93 : vector<8x1xf32>
    %95 = vector.shape_cast %94 : vector<8x1xf32> to vector<8x1xf32>
    %96 = vector.broadcast %95 : vector<8x1xf32> to vector<8x128xf32>
    %c0_42 = arith.constant 0 : index
    %c0_43 = arith.constant 0 : index
    %97 = vector.load %arg6[%c0_42, %c0_43] : memref<8x128xf32, #tpu.memory_space<vmem>>, vector<8x128xf32>
    tpu.vector_store %arg6[%c0_42, %c0_43], %96 {strides = array<i32>} : memref<8x128xf32, #tpu.memory_space<vmem>>, vector<8x128xf32>,
    %98 = tpu.iota {dimensions = array<i32: 1>} : vector<1x128xi32>
    %c0_i32 = arith.constant 0 : i32
    %99 = vector.broadcast %c0_i32 : i32 to vector<1x128xi32>
    %100 = arith.cmpi eq, %98, %99 : vector<1x128xi32>
    %c1_i32 = arith.constant 1 : i32
    %101 = vector.broadcast %c1_i32 : i32 to vector<1x128xi32>
    %102 = arith.cmpi eq, %98, %101 : vector<1x128xi32>
    %cst_44 = arith.constant 0.000000e+00 : f32
    %103 = vector.broadcast %69 : f32 to vector<1x128xf32>
    %104 = vector.broadcast %cst_44 : f32 to vector<1x128xf32>
    %105 = arith.select %102, %103, %104 : vector<1x128xi1>, vector<1x128xf32>
    %106 = vector.broadcast %76 : f32 to vector<1x128xf32>
    %107 = arith.select %100, %106, %105 : vector<1x128xi1>, vector<1x128xf32>
    %c0_45 = arith.constant 0 : index
    %c0_46 = arith.constant 0 : index
    %108 = vector.load %arg7[%c0_45, %c0_46] : memref<1x128xf32, #tpu.memory_space<vmem>>, vector<1x128xf32>
    tpu.vector_store %arg7[%c0_45, %c0_46], %107 {strides = array<i32>} : memref<1x128xf32, #tpu.memory_space<vmem>>, vector<1x128xf32>,
    return
  }
}

</mosaic_0001>

<bundles_post_ra>
// kernel: tpu_custom_call.1
= control target key start
LH: loop header
LB: loop body
LE: loop exit
PB: predicated region body
PF: predicated region fallthrough
CT: control target
= control target key end

     0   :  { %13 = vsyncpa [#allocation3], 0  ;;  %vm45_vm0 = vcmask 261120   ;;  %s1524_s0 = inlined_call_operand.vmem [shape: f32[16,32], index: 0, kind: input, shape index: {}]   ;;  %s1525_s1 = inlined_call_operand.vmem [shape: s32[8,1], index: 1, kind: input, shape index: {}]   ;;  %s1526_s2 = inlined_call_operand.vmem [shape: f32[32,128], index: 2, kind: input, shape index: {}]   ;;  %s1527_s3 = inlined_call_operand.vmem [shape: f32[8,128], index: 3, kind: input, shape index: {}]   ;;  %s1528_s4 = inlined_call_operand.vmem [shape: f32[128,648], index: 4, kind: input, shape index: {}]   ;;  %s1529_s5 = inlined_call_operand.vmem [shape: f32[1,648], index: 5, kind: input, shape index: {}]   ;;  %s1530_s6 = inlined_call_operand.hbm [shape: f32[8,128], index: 6, kind: output, shape index: {0}]   ;;  %s1531_s7 = inlined_call_operand.hbm [shape: f32[1,128], index: 7, kind: output, shape index: {1}]  }
   0x1   :  { %v35_v0 = vld [vmem:[%s1526_s2] sm:$0xff]  ;;  %v36_v1 = vld [vmem:[%s1526_s2 + $0x8] sm:$0xff]  ;;  %v37_v2 = vld [vmem:[%s1526_s2 + $0x10] sm:$0xff] }
   0x2   :  { %v881_v3 = vpack.c.bf16 %v36_v1, %v35_v0  ;;  %v38_v4 = vld [vmem:[%s1526_s2 + $0x18] sm:$0xff]  ;;  %v27_v5 = vld [vmem:[%s1524_s0] sm:$0xff]  ;;  %v130_v8 = vld [vmem:[%s1528_s4 + $0x30] sm:$0xff] }
   0x3   :  { %v885_v6 = vpack.c.bf16 %v38_v4, %v37_v2  ;;  %803 = vmatprep.mubr.msk.f32.mxu1 %vm45_vm0, %v27_v5  ;;  %v129_v7 = vld [vmem:[%s1528_s4] sm:$0xff]  ;;  %v132_v11 = vld [vmem:[%s1528_s4 + $0x90] sm:$0xff] }
   0x4   :  { %882 = vmatprep.subr.bf16.mxu1 %v881_v3  ;;  %v889_v9 = vpack.c.bf16 %v130_v8, %v129_v7  ;;  %v131_v10 = vld [vmem:[%s1528_s4 + $0x60] sm:$0xff] }
   0x5   :  { %884 = vmatpush3.bf16.msra.mxu1 %v881_v3 }
   0x6   :  { %886 = vmatprep.subr.bf16.mxu1 %v885_v6 }
   0x7   :  { %14 = vsyncpa [#allocation5], 0  ;;  %v28_v12 = vld [vmem:[%s1524_s0 + $0x8] sm:$0xff]  ;;  %v893_v13 = vpack.c.bf16 %v132_v11, %v131_v10  ;;  %v133_v14 = vld [vmem:[%s1528_s4 + $0xc0] sm:$0xff]  ;;  %v1078_v35 = vmov 0   ;;  %v1079_v36 = vmov 0.0|0.0  }
   0x8   :  { %v134_v15 = vld [vmem:[%s1528_s4 + $0xf0] sm:$0xff]  ;;  %v135_v17 = vld [vmem:[%s1528_s4 + $0x120] sm:$0xff]  ;;  %1023 = vset.pattern.permute.xlu0 %v1078_v35  ;;  %v235_v38 = vld [vmem:[%s1528_s4 + $0x8] sm:$0xff]  ;;  %vm1080_vm1 = vmmov 0   ;;  %vm425_vm3 = vcmask 64512   ;;  %vm655_vm4 = vcmask 7168  }
   0x9   :  { %888 = vmatpush3.bf16.msra.mxu1 %v885_v6  ;;  %v897_v16 = vpack.c.bf16 %v134_v15, %v133_v14  ;;  %v136_v18 = vld [vmem:[%s1528_s4 + $0x150] sm:$0xff]  ;;  %v137_v20 = vld [vmem:[%s1528_s4 + $0x180] sm:$0xff]  ;;  %v237_v39 = vld [vmem:[%s1528_s4 + $0x38] sm:$0xff]  ;;  %s1082_s10 = smov [#allocation4]  }
   0xa   :  { %890 = vmatprep.subr.bf16.mxu1 %v889_v9  ;;  %v901_v19 = vpack.c.bf16 %v136_v18, %v135_v17  ;;  %v138_v21 = vld [vmem:[%s1528_s4 + $0x1b0] sm:$0xff]  ;;  %v139_v23 = vld [vmem:[%s1528_s4 + $0x1e0] sm:$0xff]  ;;  %v923_v42 = vpack.c.bf16 %v237_v39, %v235_v38  ;;  %v239_v44 = vld [vmem:[%s1528_s4 + $0x68] sm:$0xff]  ;;  %s730_s11 = sshll.u32 %s1082_s10, 4  ;;  %s731_s11 = int_to_ptr.vmem [resolvable:$true] %s730_s11 }
   0xb   :  { %v905_v22 = vpack.c.bf16 %v138_v21, %v137_v20  ;;  %v140_v24 = vld [vmem:[%s1528_s4 + $0x210] sm:$0xff]  ;;  %v141_v26 = vld [vmem:[%s1528_s4 + $0x240] sm:$0xff]  ;;  %v241_v45 = vld [vmem:[%s1528_s4 + $0x98] sm:$0xff]  ;;  %s1030_s18 = scalar_lea.vmem %s731_s11, 16  ;;  %s1034_s19 = scalar_lea.vmem %s731_s11, 32 }
   0xc   :  { %804 = vmatmul.mubr.msk.f32.vlgmr.msra.gmra.mrb[0].mxu1 %vm45_vm0, %v28_v12  ;;  %v909_v25 = vpack.c.bf16 %v140_v24, %v139_v23  ;;  %v142_v27 = vld [vmem:[%s1528_s4 + $0x270] sm:$0xff]  ;;  %v143_v29 = vld [vmem:[%s1528_s4 + $0x2a0] sm:$0xff]  ;;  %v927_v46 = vpack.c.bf16 %v241_v45, %v239_v44  ;;  %v243_v50 = vld [vmem:[%s1528_s4 + $0xc8] sm:$0xff]  ;;  %p1031_p0 = scmp.ne.s32.totalorder %s731_s11, %s1030_s18  ;;  %p1035_p1 = scmp.lt.s32.totalorder %s731_s11, %s731_s11 }
   0xd   :  { %892 = vmatpush3.bf16.msra.mxu1 %v889_v9  ;;  %v913_v28 = vpack.c.bf16 %v142_v27, %v141_v26  ;;  %v144_v30 = vld [vmem:[%s1528_s4 + $0x2d0] sm:$0xff]  ;;  %v226_v32 = vld [vmem:[%s1525_s1] sm:$0xff]  ;;  %v245_v51 = vld [vmem:[%s1528_s4 + $0xf8] sm:$0xff]  ;;  %p1036_p2 = scmp.lt.s32.totalorder %s1034_s19, %s1030_s18 }
   0xe   :  { %894 = vmatprep.subr.bf16.mxu1 %v893_v13  ;;  %v917_v31 = vpack.c.bf16 %v144_v30, %v143_v29  ;;  %v236_v33 = vld [vmem:[%s1528_s4 + $0x10] sm:$0xff]  ;;  %v238_v34 = vld [vmem:[%s1528_s4 + $0x40] sm:$0xff]  ;;  %230 = vperm.xlu0 %1023, %v226_v32   ;;  %v931_v52 = vpack.c.bf16 %v245_v51, %v243_v50  ;;  %v247_v56 = vld [vmem:[%s1528_s4 + $0x128] sm:$0xff]  ;;  %v1081_v50 = vmov 0.0   ;;  %v227_v51 = vlaneseq }
   0xf   :  { %v921_v37 = vpack.c.bf16 %v238_v34, %v236_v33  ;;  %v240_v40 = vld [vmem:[%s1528_s4 + $0x70] sm:$0xff]  ;;  %v242_v41 = vld [vmem:[%s1528_s4 + $0xa0] sm:$0xff]  ;;  %v249_v57 = vld [vmem:[%s1528_s4 + $0x158] sm:$0xff]  ;;  %331 = vmatprep.mubr.f32.mxu0 %v1081_v50  ;;  %p1037_p3 = por %p1036_p2, %p1035_p1 }
  0x10   :  { %v925_v43 = vpack.c.bf16 %v242_v41, %v240_v40  ;;  %v244_v47 = vld [vmem:[%s1528_s4 + $0xd0] sm:$0xff]  ;;  %v246_v48 = vld [vmem:[%s1528_s4 + $0x100] sm:$0xff]  ;;  %v935_v58 = vpack.c.bf16 %v249_v57, %v247_v56  ;;  %v251_v62 = vld [vmem:[%s1528_s4 + $0x188] sm:$0xff] }
  0x11   :  { %896 = vmatpush3.bf16.msra.mxu1 %v893_v13  ;;  %922 = vmatprep.subr.bf16.mxu0 %v921_v37  ;;  %v929_v49 = vpack.c.bf16 %v246_v48, %v244_v47  ;;  %v248_v53 = vld [vmem:[%s1528_s4 + $0x130] sm:$0xff]  ;;  %v250_v54 = vld [vmem:[%s1528_s4 + $0x160] sm:$0xff]  ;;  %v253_v63 = vld [vmem:[%s1528_s4 + $0x1b8] sm:$0xff]  ;;  %p1038_p4 = pnand %p1037_p3, %p1031_p0 }
  0x12   :  { %898 = vmatprep.subr.bf16.mxu1 %v897_v16  ;;  %924 = vmatpush1.bf16.msra.mxu0 %v923_v42  ;;  %v933_v55 = vpack.c.bf16 %v250_v54, %v248_v53  ;;  %v252_v59 = vld [vmem:[%s1528_s4 + $0x190] sm:$0xff]  ;;  %v254_v60 = vld [vmem:[%s1528_s4 + $0x1c0] sm:$0xff]  ;;  %v939_v0 = vpack.c.bf16 %v253_v63, %v251_v62  ;;  %v255_v4 = vld [vmem:[%s1528_s4 + $0x1e8] sm:$0xff]  ;;  %v1357_v53 = vand.u32 127, %v227_v51 }
  0x13   :  { %926 = vmatprep.subr.bf16.mxu0 %v925_v43  ;;  %v937_v61 = vpack.c.bf16 %v254_v60, %v252_v59  ;;  %v256_v1 = vld [vmem:[%s1528_s4 + $0x1f0] sm:$0xff]  ;;  %v258_v2 = vld [vmem:[%s1528_s4 + $0x220] sm:$0xff]  ;;  %v257_v5 = vld [vmem:[%s1528_s4 + $0x218] sm:$0xff] }
  0x14   :  { %v941_v3 = vpack.c.bf16 %v258_v2, %v256_v1  ;;  %v943_v6 = vpack.c.bf16 %v257_v5, %v255_v4  ;;  %v260_v7 = vld [vmem:[%s1528_s4 + $0x250] sm:$0xff]  ;;  %v262_v8 = vld [vmem:[%s1528_s4 + $0x280] sm:$0xff]  ;;  %v259_v10 = vld [vmem:[%s1528_s4 + $0x248] sm:$0xff]  ;;  %vm708_vm5 = vcmp.eq.s32.totalorder %v1357_v53, 1  ;;  %vm707_vm6 = vcmp.eq.s32.totalorder %v1357_v53, 0 }
  0x15   :  { %900 = vmatpush3.bf16.msra.mxu1 %v897_v16  ;;  %v945_v9 = vpack.c.bf16 %v262_v8, %v260_v7  ;;  %v261_v11 = vld [vmem:[%s1528_s4 + $0x278] sm:$0xff]  ;;  %v742_v13 = vld [vmem:[%s1529_s5] ss:$0 sm:$0xff]  ;;  %v339_v18 = vld [vmem:[%s1528_s4 + $0x48] sm:$0xff] }
  0x16   :  { %902 = vmatprep.subr.bf16.mxu1 %v901_v19  ;;  %928 = vmatpush1.bf16.msra.mxu0 %v927_v46  ;;  %v947_v12 = vpack.c.bf16 %v261_v11, %v259_v10  ;;  %v338_v17 = vld [vmem:[%s1528_s4 + $0x18] sm:$0xff]  ;;  %v341_v24 = vld [vmem:[%s1528_s4 + $0xa8] sm:$0xff]  ;;  %v264_v42 = vld [vmem:[%s1528_s4 + $0x2b0] sm:$0xff] }
  0x17   :  { %930 = vmatprep.subr.bf16.mxu0 %v929_v49  ;;  %v954_v21 = vpack.c.bf16 %v339_v18, %v338_v17  ;;  %v340_v23 = vld [vmem:[%s1528_s4 + $0x78] sm:$0xff]  ;;  %v343_v27 = vld [vmem:[%s1528_s4 + $0x108] sm:$0xff]  ;;  %v266_v43 = vld [vmem:[%s1528_s4 + $0x2e0] sm:$0xff] }
  0x18   :  { %v342_v26 = vld [vmem:[%s1528_s4 + $0xd8] sm:$0xff]  ;;  %v345_v30 = vld [vmem:[%s1528_s4 + $0x168] sm:$0xff]  ;;  %v949_v45 = vpack.c.bf16 %v266_v43, %v264_v42  ;;  %v517_v63 = vld [vmem:[%s1528_s4 + $0x20] sm:$0xff] }
  0x19   :  { %904 = vmatpush3.bf16.msra.mxu1 %v901_v19  ;;  %v344_v29 = vld [vmem:[%s1528_s4 + $0x138] sm:$0xff]  ;;  %v347_v33 = vld [vmem:[%s1528_s4 + $0x1c8] sm:$0xff]  ;;  %v523_v7 = vld [vmem:[%s1528_s4 + $0xb0] sm:$0xff] }
  0x1a   :  { %906 = vmatprep.subr.bf16.mxu1 %v905_v22  ;;  %932 = vmatpush1.bf16.msra.mxu0 %v931_v52  ;;  %v346_v32 = vld [vmem:[%s1528_s4 + $0x198] sm:$0xff]  ;;  %v349_v37 = vld [vmem:[%s1528_s4 + $0x228] sm:$0xff]  ;;  %v745_v52 = vld [vmem:[%s1529_s5 + $0x1] ss:$0 sm:$0xff] }
  0x1b   :  { %934 = vmatprep.subr.bf16.mxu0 %v933_v55  ;;  %v966_v34 = vpack.c.bf16 %v347_v33, %v346_v32  ;;  %v348_v35 = vld [vmem:[%s1528_s4 + $0x1f8] sm:$0xff]  ;;  %v351_v40 = vld [vmem:[%s1528_s4 + $0x288] sm:$0xff]  ;;  %v529_v18 = vld [vmem:[%s1528_s4 + $0x140] sm:$0xff] }
  0x1c   :  { %v969_v38 = vpack.c.bf16 %v349_v37, %v348_v35  ;;  %v350_v39 = vld [vmem:[%s1528_s4 + $0x258] sm:$0xff]  ;;  %v353_v46 = vld [vmem:[%s1528_s4 + $0x2e8] sm:$0xff]  ;;  %v541_v37 = vld [vmem:[%s1528_s4 + $0x260] sm:$0xff] }
  0x1d   :  { %908 = vmatpush3.bf16.msra.mxu1 %v905_v22  ;;  %v972_v41 = vpack.c.bf16 %v351_v40, %v350_v39  ;;  %v352_v44 = vld [vmem:[%s1528_s4 + $0x2b8] sm:$0xff]  ;;  %v518_v55 = vld [vmem:[%s1528_s4 + $0x28] sm:$0xff]  ;;  %v545_v43 = vld [vmem:[%s1528_s4 + $0x2c0] sm:$0xff] }
  0x1e   :  { %910 = vmatprep.subr.bf16.mxu1 %v909_v25  ;;  %936 = vmatpush1.bf16.msra.mxu0 %v935_v58  ;;  %v265_v47 = vld [vmem:[%s1528_s4 + $0x2d8] sm:$0xff]  ;;  %v975_v48 = vpack.c.bf16 %v353_v46, %v352_v44  ;;  %v522_v1 = vld [vmem:[%s1528_s4 + $0x88] sm:$0xff]  ;;  %v547_v44 = vld [vmem:[%s1528_s4 + $0x2f0] sm:$0xff] }
  0x1f   :  { %938 = vmatprep.subr.bf16.mxu0 %v937_v61  ;;  %v520_v56 = vld [vmem:[%s1528_s4 + $0x58] sm:$0xff]  ;;  %v424_v61 = vld [vmem:[%s1527_s3] sm:$0xff]  ;;  %v526_v8 = vld [vmem:[%s1528_s4 + $0xe8] sm:$0xff] }
  0x20   :  { %v977_v62 = vpack.c.bf16 %v520_v56, %v518_v55  ;;  %v524_v2 = vld [vmem:[%s1528_s4 + $0xb8] sm:$0xff]  ;;  %v542_v33 = vld [vmem:[%s1528_s4 + $0x268] sm:$0xff] }
  0x21   :  { %912 = vmatpush3.bf16.msra.mxu1 %v909_v25  ;;  %v957_v25 = vpack.c.bf16 %v341_v24, %v340_v23  ;;  %v981_v5 = vpack.c.bf16 %v524_v2, %v522_v1  ;;  %v533_v24 = vld [vmem:[%s1528_s4 + $0x1a0] sm:$0xff]  ;;  %v546_v40 = vld [vmem:[%s1528_s4 + $0x2c8] sm:$0xff] }
  0x22   :  { %914 = vmatprep.subr.bf16.mxu1 %v913_v28  ;;  %940 = vmatpush1.bf16.msra.mxu0 %v939_v0  ;;  %v519_v0 = vld [vmem:[%s1528_s4 + $0x50] sm:$0xff] }
  0x23   :  { %942 = vmatprep.subr.bf16.mxu0 %v941_v3  ;;  %v979_v4 = vpack.c.bf16 %v519_v0, %v517_v63 }
  0x25   :  { %916 = vmatpush3.bf16.msra.mxu1 %v913_v28  ;;  %v960_v28 = vpack.c.bf16 %v343_v27, %v342_v26  ;;  %v538_v26 = vld [vmem:[%s1528_s4 + $0x208] sm:$0xff]  ;;  %v540_v27 = vld [vmem:[%s1528_s4 + $0x238] sm:$0xff] }
  0x26   :  { %918 = vmatprep.subr.bf16.mxu1 %v917_v31  ;;  %944 = vmatpush1.bf16.msra.mxu0 %v943_v6  ;;  %v521_v6 = vld [vmem:[%s1528_s4 + $0x80] sm:$0xff] }
  0x27   :  { %946 = vmatprep.subr.bf16.mxu0 %v945_v9  ;;  %v528_v9 = vld [vmem:[%s1528_s4 + $0x118] sm:$0xff]  ;;  %v983_v10 = vpack.c.bf16 %v523_v7, %v521_v6 }
  0x28   :  { %v985_v11 = vpack.c.bf16 %v528_v9, %v526_v8 }
  0x29   :  { %920 = vmatpush3.bf16.msra.mxu1 %v917_v31  ;;  %v963_v31 = vpack.c.bf16 %v345_v30, %v344_v29  ;;  %v997_v29 = vpack.c.bf16 %v540_v27, %v538_v26  ;;  %v537_v30 = vld [vmem:[%s1528_s4 + $0x200] sm:$0xff] }
  0x2a   :  { %953 = vmatprep.subr.bf16.mxu1 %v1079_v36  ;;  %948 = vmatpush1.bf16.msra.mxu0 %v947_v12  ;;  %v525_v12 = vld [vmem:[%s1528_s4 + $0xe0] sm:$0xff] }
  0x2b   :  { %950 = vmatprep.subr.bf16.mxu0 %v949_v45  ;;  %v1007_v45 = vpack.c.bf16 %v547_v44, %v545_v43 }
  0x8d   :  { %v231_v54 = vpop.permute.xlu0 %230 }
  0x8e   :  { %vm232_vm2 = vcmp.eq.s32.totalorder %v1357_v53, %v231_v54  ;;  %v749_v54 = vld [vmem:[%s1529_s5 + $0x3] ss:$0 sm:$0xff] }
  0x8f   :  { %v1385_v3 = vsel %vm232_vm2, 1.0, %v1081_v50 }
  0xdf   :  { %v805_v14 = vpop.f32.mrb[0].mxu1 }
  0xe0   :  { %v124_v15 = vadd.f32 %v805_v14, %v742_v13  ;;  %v118_v16 = vpop.f32.mrb[1].mxu1  ;;  %v530_v14 = vld [vmem:[%s1528_s4 + $0x148] sm:$0xff] }
  0xe1   :  { %v119_v19 = vadd.f32 %v742_v13, %v118_v16  ;;  %v527_v13 = vld [vmem:[%s1528_s4 + $0x110] sm:$0xff] }
  0xe2   :  { %v128_v22 = vmax.f32 %v124_v15, 0.0  ;;  %v532_v15 = vld [vmem:[%s1528_s4 + $0x178] sm:$0xff]  ;;  %v987_v16 = vpack.c.bf16 %v527_v13, %v525_v12 }
  0xe3   :  { %v127_v20 = vmax.f32 %v119_v19, 0.0  ;;  %v989_v17 = vpack.c.bf16 %v532_v15, %v530_v14  ;;  %v531_v19 = vld [vmem:[%s1528_s4 + $0x170] sm:$0xff] }
  0xe5   :  { %838 = vmatprep.mubr.f32.mxu1 %v127_v20  ;;  %v534_v20 = vld [vmem:[%s1528_s4 + $0x1a8] sm:$0xff] }
  0xe6   :  { %839 = vmatmul.mubr.f32.vlgmr.msra.gmra.mrb[2].mxu1 %v128_v22  ;;  %v991_v22 = vpack.c.bf16 %v531_v19, %v529_v18 }
  0xe7   :  { %955 = vmatpush3.bf16.msra.mxu1 %v954_v21  ;;  %873 = vmatprep.mubr.msk.f32.mxu1 %vm1080_vm1, %v1081_v50  ;;  %v536_v21 = vld [vmem:[%s1528_s4 + $0x1d8] sm:$0xff] }
  0xe8   :  { %956 = vmatprep.subr.bf16.mxu1 %v1079_v36  ;;  %v993_v23 = vpack.c.bf16 %v536_v21, %v534_v20 }
  0xeb   :  { %958 = vmatpush3.bf16.msra.mxu1 %v957_v25  ;;  %v535_v25 = vld [vmem:[%s1528_s4 + $0x1d0] sm:$0xff] }
  0xec   :  { %959 = vmatprep.subr.bf16.mxu1 %v1079_v36 }
  0xef   :  { %961 = vmatpush3.bf16.msra.mxu1 %v960_v28  ;;  %v995_v28 = vpack.c.bf16 %v535_v25, %v533_v24 }
  0xf0   :  { %962 = vmatprep.subr.bf16.mxu1 %v1079_v36 }
  0xf3   :  { %964 = vmatpush3.bf16.msra.mxu1 %v963_v31  ;;  %v539_v31 = vld [vmem:[%s1528_s4 + $0x230] sm:$0xff] }
  0xf4   :  { %965 = vmatprep.subr.bf16.mxu1 %v1079_v36  ;;  %v999_v32 = vpack.c.bf16 %v539_v31, %v537_v30 }
  0xf7   :  { %967 = vmatpush3.bf16.msra.mxu1 %v966_v34  ;;  %v544_v34 = vld [vmem:[%s1528_s4 + $0x298] sm:$0xff] }
  0xf8   :  { %968 = vmatprep.subr.bf16.mxu1 %v1079_v36  ;;  %v1001_v35 = vpack.c.bf16 %v544_v34, %v542_v33 }
  0xfb   :  { %970 = vmatpush3.bf16.msra.mxu1 %v969_v38  ;;  %v543_v38 = vld [vmem:[%s1528_s4 + $0x290] sm:$0xff] }
  0xfc   :  { %971 = vmatprep.subr.bf16.mxu1 %v1079_v36  ;;  %v1003_v39 = vpack.c.bf16 %v543_v38, %v541_v37 }
  0xff   :  { %973 = vmatpush3.bf16.msra.mxu1 %v972_v41  ;;  %v548_v41 = vld [vmem:[%s1528_s4 + $0x2f8] sm:$0xff] }
 0x100   :  { %974 = vmatprep.subr.bf16.mxu1 %v1079_v36  ;;  %v263_v36 = vld [vmem:[%s1528_s4 + $0x2a8] sm:$0xff]  ;;  %v1005_v42 = vpack.c.bf16 %v548_v41, %v546_v40 }
 0x101   :  { %v951_v49 = vpack.c.bf16 %v265_v47, %v263_v36  ;;  %v748_v36 = vld [vmem:[%s1529_s5 + $0x2] ss:$0 sm:$0xff] }
 0x103   :  { %976 = vmatpush3.bf16.msra.mxu1 %v975_v48  ;;  %952 = vmatpush1.bf16.msra.mxu0 %v951_v49 }
 0x104   :  { %876 = vmatprep.subr.mxu0 %v1081_v50 }
 0x1b9   :  { %v840_v57 = vpop.f32.mrb[2].mxu1 }
 0x1ba   :  { %v1365_v58 = vadd.f32 %v840_v57, %v745_v52  ;;  %v217_v59 = vpop.f32.mrb[3].mxu1 }
 0x1bb   :  { %v218_v60 = vadd.f32 %v745_v52, %v217_v59 }
 0x1bc   :  { %874 = vmatmul.mubr.f32.vlgmr.msra.gmra.mrb[4].mxu1 %v1365_v58 }
 0x1bd   :  { %332 = vmatmul.mubr.f32.vlgmr.msra.gmra.mrb[0].mxu0 %v218_v60 }
 0x1be   :  { %877 = vmatpush3.msra.mxu0 %v424_v61  ;;  %878 = vmatprep.mubr.msk.f32.mxu0 %vm1080_vm1, %v1081_v50 }
 0x1bf   :  { %978 = vmatprep.subr.bf16.mxu0 %v977_v62  ;;  %v750_v62 = vld [vmem:[%s1529_s5 + $0x5] ss:$0 sm:$0xff] }
 0x1c1   :  { %879 = vmatmul.mubr.msk.f32.vlgmr.msra.gmra.mrb[2].mxu0 %vm425_vm3, %v1385_v3 }
 0x1c2   :  { %980 = vmatpush1.bf16.msra.mxu0 %v979_v4  ;;  %613 = vmatprep.mubr.f32.mxu0 %v1081_v50 }
 0x1c3   :  { %982 = vmatprep.subr.bf16.mxu0 %v981_v5 }
 0x1c6   :  { %984 = vmatpush1.bf16.msra.mxu0 %v983_v10 }
 0x1c7   :  { %986 = vmatprep.subr.bf16.mxu0 %v985_v11 }
 0x1ca   :  { %988 = vmatpush1.bf16.msra.mxu0 %v987_v16 }
 0x1cb   :  { %990 = vmatprep.subr.bf16.mxu0 %v989_v17 }
 0x1ce   :  { %992 = vmatpush1.bf16.msra.mxu0 %v991_v22 }
 0x1cf   :  { %994 = vmatprep.subr.bf16.mxu0 %v993_v23 }
 0x1d2   :  { %996 = vmatpush1.bf16.msra.mxu0 %v995_v28 }
 0x1d3   :  { %998 = vmatprep.subr.bf16.mxu0 %v997_v29 }
 0x1d6   :  { %1000 = vmatpush1.bf16.msra.mxu0 %v999_v32 }
 0x1d7   :  { %1002 = vmatprep.subr.bf16.mxu0 %v1001_v35 }
 0x1da   :  { %1004 = vmatpush1.bf16.msra.mxu0 %v1003_v39 }
 0x1db   :  { %1006 = vmatprep.subr.bf16.mxu0 %v1005_v42 }
 0x1de   :  { %1008 = vmatpush1.bf16.msra.mxu0 %v1007_v45 }
 0x28f   :  { %v420_v46 = vpop.f32.mrb[4].mxu1 }
 0x290   :  { %v333_v47 = vpop.f32.mrb[0].mxu0  ;;  %v875_v48 = vpop.f32.mrb[5].mxu1 }
 0x291   :  { %v499_v49 = vadd.f32 %v420_v46, %v333_v47  ;;  %v335_v51 = vpop.f32.mrb[1].mxu0 }
 0x293   :  { %v506_v52 = vadd.f32 %v748_v36, %v499_v49 }
 0x294   :  { %v495_v55 = vpop.f32.mrb[2].mxu0 }
 0x295   :  { %v507_v56 = vmax.f32 %v506_v52, 0.0  ;;  %v508_v57 = vadd.f32 %v495_v55, %v335_v51  ;;  %v880_v59 = vpop.f32.mrb[3].mxu0 }
 0x297   :  { %v515_v60 = vadd.f32 %v749_v54, %v508_v57  ;;  %614 = vmatmul.mubr.f32.vlgmr.msra.gmra.mrb[4].mxu0 %v507_v56 }
 0x298   :  { %618 = vmatprep.mubr.f32.mxu0 %v1081_v50  ;;  %v751_v50 = vld [vmem:[%s1529_s5 + $0x4] ss:$0 sm:$0xff] }
 0x299   :  { %v516_v61 = vmax.f32 %v515_v60, 0.0 }
 0x29b   :  { %619 = vmatmul.mubr.f32.gmra.mrb[6].mxu0 %v516_v61 }
 0x36a   :  { %v615_v63 = vpop.f32.mrb[4].mxu0 }
 0x36b   :  { %v616_v0 = vpop.f32.mrb[5].mxu0 }
 0x36c   :  { %v630_v1 = vadd.f32 %v750_v62, %v616_v0 }
 0x36e   :  { %v620_v2 = vpop.f32.mrb[6].mxu0  ;;  %v638_v4 = vsel %vm425_vm3, %v630_v1, -inf  ;;  %v650_v12 = vmul.f32 %v1385_v3, %v630_v1 }
 0x36f   :  { %639 = vmax.xlane.f32.xlu0 %v638_v4  ;;  %v622_v5 = vpop.f32.mrb[7].mxu0  ;;  %v637_v10 = vadd.f32 %v751_v50, %v620_v2 }
 0x370   :  { %v651_v14 = vsel %vm425_vm3, %v650_v12, 0.0 }
 0x371   :  { %v669_v13 = vsub.f32 %v637_v10, %v1365_v58 }
 0x373   :  { %v670_v15 = vmul.f32 %v669_v13, %v669_v13 }
 0x3fc   :  { %v640_v6 = vpop.xlane.xlu0 %639 }
 0x3fd   :  { %v641_v7 = vsub.f32 %v630_v1, %v640_v6 }
 0x3ff   :  { %v642_v8 = vmul.f32 1.442695, %v641_v7 }
 0x401   :  { %1024 = vpow2.f32 %v642_v8 }
 0x40b   :  { %v1025_v9 = vpop.eup %1024 }
 0x40c   :  { %v644_v11 = vsel %vm425_vm3, %v1025_v9, 0.0 }
 0x40d   :  { %645 = vadd.xlane.f32.xlu1 %v644_v11 }
 0x411   :  { %652 = vadd.xlane.f32.xlu1 %v651_v14 }
 0x415   :  { %671 = vadd.xlane.f32.xlu1 %v670_v15 }
 0x49a   :  { %v646_v16 = vpop.xlane.xlu1 %645 }
 0x49b   :  { %1026 = vlog2.f32 %v646_v16 }
 0x49e   :  { %v653_v20 = vpop.xlane.xlu1 %652 }
 0x4a2   :  { %v672_v23 = vpop.xlane.xlu1 %671 }
 0x4a3   :  { %v1488_v3 = vmul.f32 0.0078125, %v672_v23  ;;  %v673_v24 = vrot.slane %v672_v23, 4 }
 0x4a5   :  { %v1027_v17 = vpop.eup %1026  ;;  %v685_v58 = vrot.slane %v1488_v3, 4  ;;  %v674_v25 = vadd.f32 %v673_v24, %v672_v23 }
 0x4a6   :  { %v648_v18 = vmul.f32 0.6931472, %v1027_v17 }
 0x4a7   :  { %v686_v26 = vmin.f32 %v1488_v3, %v685_v58  ;;  %v693_v27 = vmax.f32 %v1488_v3, %v685_v58  ;;  %v675_v29 = vrot.slane %v674_v25, 2 }
 0x4a8   :  { %v649_v19 = vadd.f32 %v648_v18, %v640_v6 }
 0x4a9   :  { %v687_v31 = vrot.slane %v686_v26, 2  ;;  %v694_v32 = vrot.slane %v693_v27, 2  ;;  %v676_v34 = vadd.f32 %v675_v29, %v674_v25 }
 0x4aa   :  { %v654_v21 = vsub.f32 %v649_v19, %v653_v20 }
 0x4ab   :  { %v688_v37 = vmin.f32 %v686_v26, %v687_v31  ;;  %v695_v38 = vmax.f32 %v693_v27, %v694_v32  ;;  %v677_v40 = vrot.slane %v676_v34, 1 }
 0x4ac   :  { %v656_v22 = vsel %vm655_vm4, %v654_v21, 0.0 }
 0x4ad   :  { %657 = vadd.xlane.f32.xlu1 %v656_v22  ;;  %v689_v42 = vrot.slane %v688_v37, 1  ;;  %v696_v43 = vrot.slane %v695_v38, 1  ;;  %v678_v45 = vadd.f32 %v677_v40, %v676_v34 }
 0x4af   :  { %v690_v46 = vmin.f32 %v688_v37, %v689_v42  ;;  %v697_v36 = vmax.f32 %v695_v38, %v696_v43 }
 0x53a   :  { %v658_v28 = vpop.xlane.xlu1 %657 }
 0x53b   :  { %v659_v30 = vrot.slane %v658_v28, 4 }
 0x53d   :  { %v660_v33 = vadd.f32 %v659_v30, %v658_v28 }
 0x53f   :  { %v661_v35 = vrot.slane %v660_v33, 2 }
 0x541   :  { %v662_v39 = vadd.f32 %v661_v35, %v660_v33 }
 0x543   :  { %v663_v41 = vrot.slane %v662_v39, 1 }
 0x545   :  { %v664_v44 = vadd.f32 %v663_v41, %v662_v39 }
 0x547   :  { %1009 = vpush %v664_v44 }
 0x548   :  { %1011 = vpush %v678_v45 }
 0x549   :  { %1013 = vpush %v690_v46 }
 0x54a   :  { %1015 = vpush %v697_v36 }
 0x578   :  { %s1010_s5 = spop %1009 }
 0x579   :  { %s668_s12 = smul.f32 0.125, %s1010_s5  ;;  %s1012_s13 = spop %1011 }
 0x57a   :  { %s682_s14 = smul.f32 0.0009765625, %s1012_s13  ;;  %s1494_s2 = spop %1013 }
 0x57b   :  { %v709_v47 = vstv %s668_s12  ;;  %s1016_s15 = spop %1015 }
 0x57c   :  { %v710_v48 = vsel %vm708_vm5, %v709_v47, 0.0  ;;  %v711_v49 = vstv %s682_s14  ;;  %s701_s16 = ssub.f32 %s1016_s15, %s1494_s2 }
 0x57d   :  { %v712_v51 = vsel %vm707_vm6, %v711_v49, %v710_v48 }
 0x57e   :  { %s702_s17 = sadd.f32 1e-08, %s701_s16  ;;  %713 = vst [vmem:[#allocation4] sm:$0x1] %v712_v51 }
 0x57f   :  { %1041 = shalt.err (!%p1038_p4)
}
 0x580   :  { %s1042_s22 = scalar_lea.hbm %s1531_s7, 16 }
 0x581   :  { %p1043_p5 = scmp.ne.s32.totalorder %s1531_s7, %s1042_s22  ;;  %p1046_p6 = scmp.lt.u32.totalorder %s1042_s22, %s1531_s7 }
 0x583   :  { %p1048_p7 = pnand %p1046_p6, %p1043_p5 }
 0x585   :  { %1051 = shalt.err (!%p1048_p7)
}
 0x586   :  { %733 = dma.vmem_to_hbm [thread:$0]  %s731_s11, 16, %s1531_s7, [#allocation5]   ;;  %v703_v53 = vstv %s702_s17  ;;  %v699_v52 = vstv %s1494_s2 }
 0x587   :  { %1028 = vrcp.f32 %v703_v53  ;;  %s1083_s27 = smov [#allocation2]   ;;  %v700_v54 = vsub.f32 %v1488_v3, %v699_v52 }
 0x588   :  { %s720_s28 = sshll.u32 %s1083_s27, 4  ;;  %s721_s28 = int_to_ptr.vmem [resolvable:$true] %s720_s28 }
 0x589   :  { %s1052_s3 = scalar_lea.vmem %s721_s28, 128  ;;  %p1057_p9 = scmp.lt.s32.totalorder %s721_s28, %s721_s28 }
 0x58a   :  { %p1053_p8 = scmp.ne.s32.totalorder %s721_s28, %s1052_s3  ;;  %p1058_p10 = scmp.lt.s32.totalorder %s1052_s3, %s1052_s3 }
 0x58c   :  { %p1059_p11 = por %p1058_p10, %p1057_p9 }
 0x58e   :  { %p1060_p12 = pnand %p1059_p11, %p1053_p8 }
 0x591   :  { %v1029_v55 = vpop.eup %1028 }
 0x592   :  { %v705_v56 = vmul.f32 %v1029_v55, %v700_v54 }
 0x594   :  { %706 = vst [vmem:[#allocation2] sm:$0xff] %v705_v56 }
 0x595   :  { %1063 = shalt.err (!%p1060_p12)
}
 0x596   :  { %s1064_s4 = scalar_lea.hbm %s1530_s6, 128 }
 0x597   :  { %p1065_p13 = scmp.ne.s32.totalorder %s1530_s6, %s1064_s4  ;;  %p1068_p0 = scmp.lt.u32.totalorder %s1064_s4, %s1530_s6 }
 0x599   :  { %p1070_p1 = pnand %p1068_p0, %p1065_p13 }
 0x59b   :  { %1073 = shalt.err (!%p1070_p1)
}
 0x59c   :  { %723 = dma.vmem_to_hbm [thread:$0]  %s721_s28, 128, %s1530_s6, [#allocation3]  }
 0x59d   :  { %1074 = dma.done.wait [#allocation3], 128  }
 0x59e   :  { %1075 = vsyncadd [#allocation3], 4294967168 }
 0x59f   :  { %1076 = dma.done.wait [#allocation5], 16  }
 0x5a0   :  { %1077 = vsyncadd [#allocation5], 4294967280 }
 0x5a1   :  { %740 = vsyncpa [#allocation3], 1 }
 0x5a2   :  { %741 = vsyncpa [#allocation5], 1 }

</bundles_post_ra>
